<compile_context>
chip_gen: v7x
topology: tpu7x:2x2x1
jax: 0.10.0
libtpu: 0.0.40
codegen_flags: <defaults>
</compile_context>

<pallas_src>
import functools

import jax
import jax.numpy as jnp
from jax.experimental import pallas as pl
from jax.experimental.pallas import tpu as pltpu

EPS = 1e-10

# ~2 MiB input blocks: 2x(in)+2x(out) double buffers ~= 8 MiB, well inside the
# scoped VMEM limit on v5e (16 MiB default) and v6e/v7x (32 MiB).
_TARGET_BLOCK_BYTES = 2 * 1024 * 1024
_VMEM_LIMIT_BYTES = 32 * 1024 * 1024


def _l2norm_kernel(x_ref, w_ref, o_ref):
    # x_ref : (1, C, T)  one batch element, all channels, T spatial positions
    # w_ref : (C, 1)     per-channel scale (same block for every grid point ->
    #                    resident in VMEM across the whole grid)
    # o_ref : (1, C, T)
    x = x_ref[...].astype(jnp.float32)                       # (1, C, T)
    sq_sum = jnp.sum(x * x, axis=1, keepdims=True)           # (1, 1, T) sublane reduce
    norm = jnp.sqrt(sq_sum) + EPS                            # sqrt THEN +eps (matches torch)
    inv = pl.reciprocal(norm, approx=False)                  # EUP, exact
    w = w_ref[...].astype(jnp.float32)[None, :, :]           # (1, C, 1)
    o_ref[...] = (x * inv * w).astype(o_ref.dtype)


def _pick_tile_hw(C, HW, itemsize):
    """Largest lane-dense (multiple-of-128) spatial tile under the byte budget."""
    hw_rounded = int(pl.cdiv(HW, 128)) * 128
    max_tile = max(128, (_TARGET_BLOCK_BYTES // (C * itemsize)) // 128 * 128)
    return int(min(hw_rounded, max_tile))


@functools.partial(jax.jit, static_argnames=("tile_hw",))
def l2norm_forward(x_nchw, weight, tile_hw=None):
    """x_nchw: (N, C, H, W); weight: (C,). Returns (N, C, H, W)."""
    N, C, H, W = x_nchw.shape
    HW = H * W
    if tile_hw is None:
        tile_hw = _pick_tile_hw(C, HW, jnp.dtype(x_nchw.dtype).itemsize)

    # NCHW -> (N, C, H*W): pure reshape, no transpose.
    x3 = x_nchw.reshape(N, C, HW)

    # Pad spatial axis up to a tile multiple (zeros are harmless: norm = eps,
    # and the padded lanes are sliced off afterwards).
    n_hw_tiles = int(pl.cdiv(HW, tile_hw))
    HW_pad = n_hw_tiles * tile_hw
    if HW_pad != HW:
        x3 = jnp.pad(x3, ((0, 0), (0, 0), (0, HW_pad - HW)))

    w_col = weight.reshape(C, 1)

    out3 = pl.pallas_call(
        _l2norm_kernel,
        out_shape=jax.ShapeDtypeStruct((N, C, HW_pad), x_nchw.dtype),
        grid_spec=pltpu.PrefetchScalarGridSpec(
            num_scalar_prefetch=0,
            grid=(N, n_hw_tiles),
            in_specs=[
                pl.BlockSpec((1, C, tile_hw), lambda n, j: (n, 0, j)),  # x tile
                pl.BlockSpec((C, 1), lambda n, j: (0, 0)),              # weights
            ],
            out_specs=pl.BlockSpec((1, C, tile_hw), lambda n, j: (n, 0, j)),
        ),
        compiler_params=pltpu.CompilerParams(
            dimension_semantics=("parallel", "parallel"),
            vmem_limit_bytes=_VMEM_LIMIT_BYTES,
        ),
    )(x3, w_col)

    if HW_pad != HW:
        out3 = out3[:, :, :HW]
    return out3.reshape(N, C, H, W)


def l2norm_reference(x_nchw, weight):
    norm = jnp.sqrt(jnp.sum(x_nchw.astype(jnp.float32) ** 2, axis=1,
                            keepdims=True)) + EPS
    return (weight[None, :, None, None] * (x_nchw / norm)).astype(x_nchw.dtype)


if __name__ == "__main__":
    # Small shapes consistent with the module: batch=2, channels=4, spatial=16.
    N, C, H, W = 2, 4, 16, 16
    SCALE = 20.0

    key = jax.random.PRNGKey(0)
    x = jax.random.normal(key, (N, C, H, W), dtype=jnp.float32)

    # Deterministic parameter init, mirroring init.constant_(weight, scale).
    weight = jnp.full((C,), SCALE, dtype=jnp.float32)

    out = l2norm_forward(x, weight)
    out = jax.block_until_ready(out)

    ref = l2norm_reference(x, weight)
    assert out.shape == (N, C, H, W)
    assert jnp.allclose(out, ref, atol=1e-5, rtol=1e-5), "mismatch vs reference"

    print("KERNEL_OK")
</pallas_src>

<mosaic_0001>
module attributes {stable_mosaic.version = 11 : i64} {
  func.func @_l2norm_kernel(%arg0: i32, %arg1: i32, %arg2: memref<1x4x256xf32, #tpu.memory_space<vmem>>, %arg3: memref<4x1xf32, #tpu.memory_space<vmem>>, %arg4: memref<1x4x256xf32, #tpu.memory_space<vmem>>) attributes {dimension_semantics = [#tpu.dimension_semantics<parallel>, #tpu.dimension_semantics<parallel>], iteration_bounds = array<i64: 2, 1>, scalar_prefetch = 0 : i64, scratch_operands = 0 : i64, tpu.core_type = #tpu.core_type<tc>, window_params = [{transform_indices = @transform_0, window_bounds = array<i64: 1, 4, 256>}, {pipeline_mode = #tpu.pipeline_mode<synchronous>, transform_indices = @transform_1, window_bounds = array<i64: 4, 1>}, {transform_indices = @transform_2, window_bounds = array<i64: 1, 4, 256>}]} {
    %c0 = arith.constant 0 : index
    %c0_0 = arith.constant 0 : index
    %c0_1 = arith.constant 0 : index
    %0 = vector.load %arg2[%c0, %c0_0, %c0_1] : memref<1x4x256xf32, #tpu.memory_space<vmem>>, vector<1x4x256xf32>
    %1 = arith.mulf %0, %0 : vector<1x4x256xf32>
    %cst = arith.constant dense<0.000000e+00> : vector<1x256xf32>
    %2 = vector.multi_reduction <add>, %1, %cst [1] : vector<1x4x256xf32> to vector<1x256xf32>
    %3 = vector.shape_cast %2 : vector<1x256xf32> to vector<1x1x256xf32>
    %4 = math.sqrt %3 : vector<1x1x256xf32>
    %cst_2 = arith.constant 1.000000e-10 : f32
    %5 = vector.broadcast %cst_2 : f32 to vector<1x1x256xf32>
    %6 = arith.addf %4, %5 : vector<1x1x256xf32>
    %7 = tpu.reciprocal %6 : vector<1x1x256xf32> -> vector<1x1x256xf32>
    %c0_3 = arith.constant 0 : index
    %c0_4 = arith.constant 0 : index
    %8 = vector.load %arg3[%c0_3, %c0_4] : memref<4x1xf32, #tpu.memory_space<vmem>>, vector<4x1xf32>
    %9 = vector.shape_cast %8 : vector<4x1xf32> to vector<1x4x1xf32>
    %10 = vector.broadcast %7 : vector<1x1x256xf32> to vector<1x4x256xf32>
    %11 = arith.mulf %0, %10 : vector<1x4x256xf32>
    %12 = vector.broadcast %9 : vector<1x4x1xf32> to vector<1x4x256xf32>
    %13 = arith.mulf %11, %12 : vector<1x4x256xf32>
    %c0_5 = arith.constant 0 : index
    %c0_6 = arith.constant 0 : index
    %c0_7 = arith.constant 0 : index
    %14 = vector.load %arg4[%c0_5, %c0_6, %c0_7] : memref<1x4x256xf32, #tpu.memory_space<vmem>>, vector<1x4x256xf32>
    tpu.vector_store %arg4[%c0_5, %c0_6, %c0_7], %13 {strides = array<i32>} : memref<1x4x256xf32, #tpu.memory_space<vmem>>, vector<1x4x256xf32>,
    return
  }
  func.func @transform_0(%arg0: i32, %arg1: i32) -> (i32, i32, i32) {
    %c0_i32 = arith.constant 0 : i32
    %c0_i32_0 = arith.constant 0 : i32
    return %arg0, %c0_i32, %arg1 : i32, i32, i32
  }
  func.func @transform_1(%arg0: i32, %arg1: i32) -> (i32, i32) {
    %c0_i32 = arith.constant 0 : i32
    %c0_i32_0 = arith.constant 0 : i32
    %c0_i32_1 = arith.constant 0 : i32
    return %c0_i32, %c0_i32_0 : i32, i32
  }
  func.func @transform_2(%arg0: i32, %arg1: i32) -> (i32, i32, i32) {
    %c0_i32 = arith.constant 0 : i32
    %c0_i32_0 = arith.constant 0 : i32
    return %arg0, %c0_i32, %arg1 : i32, i32, i32
  }
}

</mosaic_0001>

<bundles_post_ra>
// kernel: l2norm_forward.1
= control target key start
LH: loop header
LB: loop body
LE: loop exit
PB: predicated region body
PF: predicated region fallthrough
CT: control target
= control target key end

     0   :  { %s417_s9 = smov 0   ;;  %s419_s10 = smov 0   ;;  %s460_s0 = inlined_call_operand.vmem [shape: f32[2,4,256], index: 0, kind: input, shape index: {}]   ;;  %s461_s1 = inlined_call_operand.vmem [shape: f32[4,1], index: 1, kind: input, shape index: {}]   ;;  %s462_s2 = inlined_call_operand.vmem [shape: f32[2,4,256], index: 2, kind: output, shape index: {}]  }
   0x1   :  { %s421_s11 = smov 0  }
   0x2 LB: > { %s24_s12 = sadd.s32 1, %s394_s10  ;;  %p332_p0 = scmp.ge.s32.totalorder %s398_s11, 1  ;;  %s398_s11 = sphi %s421_s11, %s12_s11   ;;  %s394_s10 = sphi %s419_s10, %s464_s10   ;;  %s390_s9 = sphi %s417_s9, %s463_s9  }
   0x3   : > { %p26_p1 = scmp.ge.s32.totalorder %s24_s12, 2  ;;  %p133_p2 = scmp.lt.s32.totalorder %s398_s11, 3 }
   0x5   : > { %s466_s12 = smov (%p26_p1, %s24_s12), 0  ;;  %p134_p3 = pnand %p332_p0, %p133_p2 }
   0x6   : > { %v221_v0 = vld [vmem:[%s461_s1] sm:$0xf] (!%p134_p3)  ;;  %v400_v1 = vmov (!%p134_p3), 0   ;;  %p164_p4 = scmp.lt.s32.totalorder (!%p134_p3), %s390_s9, 1  ;;  %vm188_vm0 = vcmask (!%p134_p3), 1043456   ;;  %v234_v33 = vlaneseq (!%p134_p3) }
   0x7   : > { %137 = sbr.rel (%p134_p3) target bundleno = 141 (0x8d), region = 28  ;;  %367 = vset.pattern.permute.xlu0 (!%p134_p3), %v400_v1  ;;  %v401_v31 = vmov (!%p134_p3), 839922192  }
   0x8   : > { %229 = vperm.xlu0 (!%p134_p3), %367, %v221_v0   ;;  %v232_v32 = vunpack.c.l.s4 (!%p134_p3), %v401_v31  ;;  %v235_v37 = vshrl.u32 (!%p134_p3), %v234_v33, 7 }
   0xa   : > { %v233_v36 = vunpack.c.0.s8 (!%p134_p3), %v232_v32 }
   0xc   : > { %v236_v39 = vsub.s32 (!%p134_p3), %v233_v36, %v235_v37 }
   0xe   : > { %s468_s9 = smov (!%p164_p4, %s390_s9), 1 }
   0xf   : > { %s339_s15 = sshll.u32 %s468_s9, 3 }
  0x10   : > { %s171_s18 = scalar_lea.vmem %s460_s0, %s339_s15  ;;  %s181_s21 = scalar_lea.vmem %s462_s2, %s339_s15 }
  0x11   : > { %v183_v2 = vld [vmem:[%s171_s18] sm:$0xff] }
  0x12   : > { %v184_v3 = vmul.f32 %v183_v2, %v183_v2 }
  0x14   : > { %v186_v4 = vcombine.high %v184_v3, %v184_v3  ;;  %v189_v5 = vsel %vm188_vm0, %v184_v3, 0.0 }
  0x15   : > { %v190_v7 = vrot.slane %v189_v5, 4 }
  0x16   : > { %v196_v6 = vsel %vm188_vm0, %v186_v4, 0.0 }
  0x17   : > { %v197_v8 = vrot.slane %v196_v6, 4  ;;  %v191_v9 = vadd.f32 %v190_v7, %v189_v5 }
  0x19   : > { %v198_v10 = vadd.f32 %v197_v8, %v196_v6  ;;  %v192_v11 = vrot.slane %v191_v9, 2 }
  0x1b   : > { %v199_v12 = vrot.slane %v198_v10, 2  ;;  %v193_v13 = vadd.f32 %v192_v11, %v191_v9 }
  0x1d   : > { %v200_v14 = vadd.f32 %v199_v12, %v198_v10  ;;  %v194_v15 = vrot.slane %v193_v13, 1 }
  0x1f   : > { %v201_v16 = vrot.slane %v200_v14, 1  ;;  %v195_v17 = vadd.f32 %v194_v15, %v193_v13 }
  0x21   : > { %v202_v18 = vadd.f32 %v201_v16, %v200_v14  ;;  %368 = vrsqrt.f32 %v195_v17  ;;  %vm205_vm1 = vcmp.eq.f32.partialorder %v195_v17, inf  ;;  %v208_v23 = vand.u32 2147483648, %v195_v17 }
  0x22   : > { %vm207_vm3 = vcmp.eq.f32.partialorder %v195_v17, 0.0 }
  0x23   : > { %370 = vrsqrt.f32 %v202_v18  ;;  %vm212_vm2 = vcmp.eq.f32.partialorder %v202_v18, inf  ;;  %v215_v25 = vand.u32 2147483648, %v202_v18  ;;  %vm214_vm4 = vcmp.eq.f32.partialorder %v202_v18, 0.0 }
  0x2b   : > { %v369_v19 = vpop.eup %368 }
  0x2c   : > { %v204_v21 = vmul.f32 %v369_v19, %v195_v17 }
  0x2d   : > { %v371_v20 = vpop.eup %370 }
  0x2e   : > { %v211_v22 = vmul.f32 %v371_v20, %v202_v18  ;;  %v206_v24 = vsel %vm205_vm1, %v195_v17, %v204_v21 }
  0x2f   : > { %v209_v27 = vsel %vm207_vm3, %v208_v23, %v206_v24 }
  0x30   : > { %v213_v26 = vsel %vm212_vm2, %v202_v18, %v211_v22  ;;  %v217_v29 = vadd.f32 1e-10, %v209_v27 }
  0x31   : > { %v216_v28 = vsel %vm214_vm4, %v215_v25, %v213_v26 }
  0x32   : > { %v218_v30 = vadd.f32 1e-10, %v216_v28  ;;  %372 = vrcp.f32 %v217_v29 }
  0x34   : > { %374 = vrcp.f32 %v218_v30 }
  0x3c   : > { %v373_v34 = vpop.eup %372 }
  0x3e   : > { %v375_v35 = vpop.eup %374 }
  0x3f   : > { %v224_v38 = vcombine.low %v373_v34, %v375_v35 }
  0x41   : > { %v226_v40 = vmul.f32 %v224_v38, %v183_v2 }
  0x87   : > { %v230_v41 = vpop.permute.xlu0 %229 }
  0x88   : > { %v237_v42 = vrot.slane %v230_v41, %v236_v39 }
  0x8a   : > { %v239_v43 = vmul.f32 %v237_v42, %v226_v40 }
  0x8c   : > { %240 = vst [vmem:[%s181_s21] sm:$0xff] %v239_v43 }
  0x8d PF: > { %s12_s11 = sadd.s32 1, %s398_s11   ;;  %s463_s9 = smov %s394_s10 }
  0x8e   : > { %p9_p5 = scmp.ge.s32.totalorder %s12_s11, 4   ;;  %s464_s10 = smov %s466_s12 }
  0x90   :  { %11 = sbr.rel (!%p9_p5) target bundleno = 2 (0x2), region = 58 }

</bundles_post_ra>
